<compile_context>
chip_gen: v6e
topology: v6e:2x2x1
jax: 0.10.0
libtpu: 0.0.40
codegen_flags: <defaults>
</compile_context>

<pallas_src>
import jax
import jax.numpy as jnp
from jax.experimental import pallas as pl
from jax.experimental.pallas import tpu as pltpu

LN_EPS = 1e-5  # nn.LayerNorm default

_MIB = 1024 * 1024
_VMEM_BUDGET = 48 * _MIB   # tile-shrink threshold (leave headroom on v7x 64 MiB)
_VMEM_CAP = 60 * _MIB      # never request more than v7x physical minus headroom


# ------------------------------- tiling helpers ------------------------------
def _round_up(x, m):
    return ((x + m - 1) // m) * m


def _choose_row_tile(rows, target, min_tiles=2):
    """Row tile: multiple of 8, capped at `target`.

    Keeps >= min_tiles row tiles (so the "parallel" axis feeds both v7x
    TensorCores) and prefers a tile that divides the padded row count (avoids
    wrapper-side pad + output-slice HBM passes), as long as it does not shrink
    below half the chosen tile.
    """
    rows8 = _round_up(rows, 8)
    tile = min(_round_up(target, 8), rows8)
    if rows8 > 8 and _round_up(rows8, tile) // tile < min_tiles:
        tile = max(8, _round_up(-(-rows8 // min_tiles), 8))
    if rows8 % tile:
        t = tile - 8
        while t >= max(8, tile // 2):
            if rows8 % t == 0:
                return t
            t -= 8
    return tile


def _choose_n_tile(d_out):
    # Lane-dense tile; prefer multiples of 256 (2x256^2 MXU on v6e/v7x),
    # fall back to 128, else the whole d_out.
    for cand in (512, 256, 128):
        if d_out % cand == 0:
            return cand
    return d_out


def _pad_rows(x2d, tile):
    rows = x2d.shape[0]
    rows_p = _round_up(rows, tile)
    if rows_p != rows:
        x2d = jnp.pad(x2d, ((0, rows_p - rows), (0, 0)))
    return x2d, rows_p


def _vmem_limit(nbytes):
    return int(min(max(2 * nbytes, 32 * _MIB), _VMEM_CAP))


def _fused_vmem_bytes(tile_r, d, tile_n, x_bytes, w_bytes, out_bytes):
    return (2 * tile_r * d * x_bytes            # x tile (double-buffered)
            + 2 * d * tile_n * w_bytes          # W tile (double-buffered)
            + 2 * tile_r * tile_n * out_bytes   # out tile (double-buffered)
            + 2 * tile_n * 4 + 4 * d * 4        # bias + gamma/beta
            + tile_r * d * w_bytes)             # normalized-row scratch (bf16)


# ------------------------- standalone LayerNorm kernel -----------------------
def _ln_kernel(x_ref, g_ref, b_ref, o_ref):
    x = x_ref[...].astype(jnp.float32)
    mean = jnp.mean(x, axis=-1, keepdims=True)
    c = x - mean
    var = jnp.mean(c * c, axis=-1, keepdims=True)          # biased var (PyTorch)
    inv = jax.lax.rsqrt(var + LN_EPS)
    o_ref[...] = (c * inv * g_ref[...] + b_ref[...]).astype(o_ref.dtype)


def layernorm_pallas(x2d, g2d, b2d, *, row_tile=1024):
    rows, d = x2d.shape
    tile_r = _choose_row_tile(rows, row_tile)
    x2d_p, rows_p = _pad_rows(x2d, tile_r)

    xb = x2d.dtype.itemsize
    est = 4 * tile_r * d * xb + 4 * d * 4   # in + out double-buffered, gamma/beta

    out = pl.pallas_call(
        _ln_kernel,
        out_shape=jax.ShapeDtypeStruct((rows_p, d), x2d.dtype),
        grid=(rows_p // tile_r,),
        in_specs=[
            pl.BlockSpec((tile_r, d), lambda i: (i, 0)),
            pl.BlockSpec((1, d), lambda i: (0, 0)),
            pl.BlockSpec((1, d), lambda i: (0, 0)),
        ],
        out_specs=pl.BlockSpec((tile_r, d), lambda i: (i, 0)),
        compiler_params=pltpu.CompilerParams(
            dimension_semantics=("parallel",),
            vmem_limit_bytes=_vmem_limit(est)),
    )(x2d_p, g2d, b2d)
    return out[:rows] if rows_p != rows else out


# ------------------- fused LayerNorm + Linear (hot path) ---------------------
def _ln_linear_kernel(x_ref, g_ref, b_ref, w_ref, bias_ref, o_ref, y_ref):
    # CORRECTNESS NOTE: the j (output-N) axis MUST be the last grid axis and
    # marked "arbitrary" -- the normalized-row scratch written at j == 0 is
    # reused by every subsequent j step of the same row tile.
    j = pl.program_id(1)

    @pl.when(j == 0)
    def _():
        # LayerNorm once per row tile (f32 math), stored in bf16 for the MXU.
        x = x_ref[...].astype(jnp.float32)
        mean = jnp.mean(x, axis=-1, keepdims=True)
        c = x - mean
        var = jnp.mean(c * c, axis=-1, keepdims=True)
        inv = jax.lax.rsqrt(var + LN_EPS)
        y_ref[...] = (c * inv * g_ref[...] + b_ref[...]).astype(y_ref.dtype)

    # bf16 x bf16 -> f32 accumulation on the MXU.
    acc = jnp.dot(y_ref[...], w_ref[...], preferred_element_type=jnp.float32)
    o_ref[...] = (acc + bias_ref[...]).astype(o_ref.dtype)


def prenorm_linear_pallas(x2d, g2d, b2d, w, bias2d, *, row_tile=512):
    rows, d = x2d.shape
    d_out = w.shape[1]
    tile_n = _choose_n_tile(d_out)
    tile_r = _choose_row_tile(rows, row_tile)

    xb = x2d.dtype.itemsize
    wb = w.dtype.itemsize
    ob = x2d.dtype.itemsize
    # Shrink the row tile if the VMEM estimate blows the (v7x-safe) budget.
    while tile_r > 8 and _fused_vmem_bytes(tile_r, d, tile_n, xb, wb, ob) > _VMEM_BUDGET:
        tile_r = max(8, _round_up(tile_r // 2, 8))

    x2d_p, rows_p = _pad_rows(x2d, tile_r)
    est = _fused_vmem_bytes(tile_r, d, tile_n, xb, wb, ob)

    out = pl.pallas_call(
        _ln_linear_kernel,
        out_shape=jax.ShapeDtypeStruct((rows_p, d_out), x2d.dtype),
        grid=(rows_p // tile_r, d_out // tile_n),
        in_specs=[
            pl.BlockSpec((tile_r, d), lambda i, j: (i, 0)),     # x row tile
            pl.BlockSpec((1, d), lambda i, j: (0, 0)),          # gamma (resident)
            pl.BlockSpec((1, d), lambda i, j: (0, 0)),          # beta  (resident)
            pl.BlockSpec((d, tile_n), lambda i, j: (0, j)),     # W column tile (bf16)
            pl.BlockSpec((1, tile_n), lambda i, j: (0, j)),     # bias tile
        ],
        out_specs=pl.BlockSpec((tile_r, tile_n), lambda i, j: (i, j)),
        scratch_shapes=[pltpu.VMEM((tile_r, d), w.dtype)],      # normalized rows (bf16)
        compiler_params=pltpu.CompilerParams(
            dimension_semantics=("parallel", "arbitrary"),
            vmem_limit_bytes=_vmem_limit(est)),
    )(x2d_p, g2d, b2d, w, bias2d)
    return out[:rows] if rows_p != rows else out


# -------------------------- plain tiled Linear kernel ------------------------
def _linear_kernel(x_ref, w_ref, bias_ref, o_ref):
    acc = jnp.dot(x_ref[...].astype(w_ref.dtype), w_ref[...],
                  preferred_element_type=jnp.float32)
    o_ref[...] = (acc + bias_ref[...]).astype(o_ref.dtype)


def linear_pallas(x2d, w, bias2d, *, row_tile=512):
    rows, d_in = x2d.shape
    d_out = w.shape[1]
    tile_n = _choose_n_tile(d_out)
    tile_r = _choose_row_tile(rows, row_tile)

    xb = x2d.dtype.itemsize
    wb = w.dtype.itemsize
    est = (2 * tile_r * d_in * xb + 2 * d_in * tile_n * wb
           + 2 * tile_r * tile_n * xb + 2 * tile_n * 4)
    while tile_r > 8 and est > _VMEM_BUDGET:
        tile_r = max(8, _round_up(tile_r // 2, 8))
        est = (2 * tile_r * d_in * xb + 2 * d_in * tile_n * wb
               + 2 * tile_r * tile_n * xb + 2 * tile_n * 4)

    x2d_p, rows_p = _pad_rows(x2d, tile_r)

    out = pl.pallas_call(
        _linear_kernel,
        out_shape=jax.ShapeDtypeStruct((rows_p, d_out), x2d.dtype),
        grid=(rows_p // tile_r, d_out // tile_n),
        in_specs=[
            pl.BlockSpec((tile_r, d_in), lambda i, j: (i, 0)),
            pl.BlockSpec((d_in, tile_n), lambda i, j: (0, j)),
            pl.BlockSpec((1, tile_n), lambda i, j: (0, j)),
        ],
        out_specs=pl.BlockSpec((tile_r, tile_n), lambda i, j: (i, j)),
        compiler_params=pltpu.CompilerParams(
            dimension_semantics=("parallel", "arbitrary"),
            vmem_limit_bytes=_vmem_limit(est)),
    )(x2d_p, w, bias2d)
    return out[:rows] if rows_p != rows else out


# --------------------------------- modules -----------------------------------
class PallasLinear:
    """Linear(d_in -> d_out) whose matmul runs in Pallas (used as PreNorm's fn).

    W is stored pre-cast to bf16 (MXU-native operands, f32 accumulation);
    bias is stored pre-cast/reshaped to (1, d_out) f32 -- no per-call casts.
    """

    def __init__(self, w, b, mxu_dtype=jnp.bfloat16):
        self.d_in, self.d_out = w.shape
        self.w = jnp.asarray(w).astype(mxu_dtype)                 # (d_in, d_out)
        self.b2d = jnp.asarray(b).reshape(1, self.d_out).astype(jnp.float32)

    def __call__(self, x):
        shape = x.shape
        x2d = x.reshape(-1, shape[-1])
        out2d = linear_pallas(x2d, self.w, self.b2d)
        return out2d.reshape(shape[:-1] + (self.d_out,))


class PreNorm:
    """PreNorm(dim, fn): y = fn(LayerNorm(x), **kwargs).

    If `fn` is a PallasLinear (the common ViT case), LayerNorm + Linear are
    fused into one Pallas kernel; otherwise LayerNorm runs as its own kernel
    and `fn` (an arbitrary callable) is applied to the result.
    """

    def __init__(self, dim, fn):
        self.dim = dim
        self.fn = fn
        # nn.LayerNorm default init: weight=1, bias=0; stored pre-reshaped f32.
        self.gamma2d = jnp.ones((1, dim), jnp.float32)
        self.beta2d = jnp.zeros((1, dim), jnp.float32)

    def __call__(self, x, **kwargs):
        orig_shape = x.shape
        d = orig_shape[-1]
        assert d == self.dim
        x2d = x.reshape(-1, d)
        if isinstance(self.fn, PallasLinear) and not kwargs:
            out2d = prenorm_linear_pallas(
                x2d, self.gamma2d, self.beta2d, self.fn.w, self.fn.b2d)
            return out2d.reshape(orig_shape[:-1] + (self.fn.d_out,))
        normed = layernorm_pallas(x2d, self.gamma2d, self.beta2d).reshape(orig_shape)
        return self.fn(normed, **kwargs)


# ----------------------------------- demo ------------------------------------
if __name__ == "__main__":
    key = jax.random.PRNGKey(0)
    B, N, D = 2, 8, 128  # small, but D lane-dense (multiple of 128)

    kx, kw, kb = jax.random.split(key, 3)
    x = jax.random.normal(kx, (B, N, D), dtype=jnp.float32)
    w = jax.random.normal(kw, (D, D), dtype=jnp.float32) * 0.02
    b = jax.random.normal(kb, (D,), dtype=jnp.float32) * 0.02

    # Pure-JAX reference: LayerNorm (f32) then Linear with bf16 operands and
    # f32 accumulation (matches the kernel's MXU math).
    mean = jnp.mean(x, axis=-1, keepdims=True)
    var = jnp.mean((x - mean) ** 2, axis=-1, keepdims=True)
    ln_ref = (x - mean) * jax.lax.rsqrt(var + LN_EPS)  # gamma=1, beta=0
    w_bf16 = w.astype(jnp.bfloat16)
    lin_ref = jnp.einsum("bnd,de->bne", ln_ref.astype(jnp.bfloat16), w_bf16,
                         preferred_element_type=jnp.float32) + b

    # 1) Fused hot path: PreNorm wrapping a Pallas Linear.
    prenorm_fused = PreNorm(D, PallasLinear(w, b))
    out_fused = jax.block_until_ready(prenorm_fused(x))
    assert out_fused.shape == (B, N, D)
    assert jnp.allclose(out_fused, lin_ref, atol=2e-2, rtol=2e-2)

    # 2) Generic path: PreNorm wrapping an arbitrary (non-fusable) fn.
    prenorm_generic = PreNorm(D, lambda y: y * 2.0)
    out_generic = jax.block_until_ready(prenorm_generic(x))
    assert out_generic.shape == (B, N, D)
    assert jnp.allclose(out_generic, ln_ref * 2.0, atol=1e-4, rtol=1e-4)

    # 3) Standalone Pallas Linear (bf16 MXU path) on the LN reference.
    lin_only = PallasLinear(w, b)
    out_lin = jax.block_until_ready(lin_only(ln_ref))
    assert out_lin.shape == (B, N, D)
    assert jnp.allclose(out_lin, lin_ref, atol=2e-2, rtol=2e-2)

    print("KERNEL_OK")
</pallas_src>

<mosaic_0001>
module attributes {stable_mosaic.version = 11 : i64} {
  func.func @_ln_linear_kernel(%arg0: i32, %arg1: i32, %arg2: memref<8x128xf32, #tpu.memory_space<vmem>>, %arg3: memref<1x128xf32, #tpu.memory_space<vmem>>, %arg4: memref<1x128xf32, #tpu.memory_space<vmem>>, %arg5: memref<128x128xbf16, #tpu.memory_space<vmem>>, %arg6: memref<1x128xf32, #tpu.memory_space<vmem>>, %arg7: memref<8x128xf32, #tpu.memory_space<vmem>>, %arg8: memref<8x128xbf16, #tpu.memory_space<vmem>>) attributes {dimension_semantics = [#tpu.dimension_semantics<parallel>, #tpu.dimension_semantics<arbitrary>], iteration_bounds = array<i64: 2, 1>, scalar_prefetch = 0 : i64, scratch_operands = 1 : i64, tpu.core_type = #tpu.core_type<tc>, window_params = [{transform_indices = @transform_0, window_bounds = array<i64: 8, 128>}, {pipeline_mode = #tpu.pipeline_mode<synchronous>, transform_indices = @transform_1, window_bounds = array<i64: 1, 128>}, {pipeline_mode = #tpu.pipeline_mode<synchronous>, transform_indices = @transform_2, window_bounds = array<i64: 1, 128>}, {transform_indices = @transform_3, window_bounds = array<i64: 128, 128>}, {transform_indices = @transform_4, window_bounds = array<i64: 1, 128>}, {transform_indices = @transform_5, window_bounds = array<i64: 8, 128>}]} {
    %c0_i32 = arith.constant 0 : i32
    %0 = arith.cmpi eq, %arg1, %c0_i32 : i32
    %1 = arith.extui %0 : i1 to i32
    %c0_i32_0 = arith.constant 0 : i32
    %2 = arith.cmpi ne, %1, %c0_i32_0 : i32
    scf.if %2 {
      %c0_8 = arith.constant 0 : index
      %c0_9 = arith.constant 0 : index
      %10 = vector.load %arg2[%c0_8, %c0_9] : memref<8x128xf32, #tpu.memory_space<vmem>>, vector<8x128xf32>
      %cst_10 = arith.constant dense<0.000000e+00> : vector<8xf32>
      %11 = vector.multi_reduction <add>, %10, %cst_10 [1] : vector<8x128xf32> to vector<8xf32>
      %12 = vector.shape_cast %11 : vector<8xf32> to vector<8x1xf32>
      %cst_11 = arith.constant 1.280000e+02 : f32
      %13 = vector.broadcast %cst_11 : f32 to vector<8x1xf32>
      %14 = arith.divf %12, %13 : vector<8x1xf32>
      %15 = vector.broadcast %14 : vector<8x1xf32> to vector<8x128xf32>
      %16 = arith.subf %10, %15 : vector<8x128xf32>
      %17 = arith.mulf %16, %16 : vector<8x128xf32>
      %cst_12 = arith.constant dense<0.000000e+00> : vector<8xf32>
      %18 = vector.multi_reduction <add>, %17, %cst_12 [1] : vector<8x128xf32> to vector<8xf32>
      %19 = vector.shape_cast %18 : vector<8xf32> to vector<8x1xf32>
      %cst_13 = arith.constant 1.280000e+02 : f32
      %20 = vector.broadcast %cst_13 : f32 to vector<8x1xf32>
      %21 = arith.divf %19, %20 : vector<8x1xf32>
      %cst_14 = arith.constant 9.99999974E-6 : f32
      %22 = vector.broadcast %cst_14 : f32 to vector<8x1xf32>
      %23 = arith.addf %21, %22 : vector<8x1xf32>
      %24 = math.rsqrt %23 : vector<8x1xf32>
      %25 = vector.broadcast %24 : vector<8x1xf32> to vector<8x128xf32>
      %26 = arith.mulf %16, %25 : vector<8x128xf32>
      %c0_15 = arith.constant 0 : index
      %c0_16 = arith.constant 0 : index
      %27 = vector.load %arg3[%c0_15, %c0_16] : memref<1x128xf32, #tpu.memory_space<vmem>>, vector<1x128xf32>
      %28 = vector.broadcast %27 : vector<1x128xf32> to vector<8x128xf32>
      %29 = arith.mulf %26, %28 : vector<8x128xf32>
      %c0_17 = arith.constant 0 : index
      %c0_18 = arith.constant 0 : index
      %30 = vector.load %arg4[%c0_17, %c0_18] : memref<1x128xf32, #tpu.memory_space<vmem>>, vector<1x128xf32>
      %31 = vector.broadcast %30 : vector<1x128xf32> to vector<8x128xf32>
      %32 = arith.addf %29, %31 : vector<8x128xf32>
      %33 = arith.truncf %32 : vector<8x128xf32> to vector<8x128xbf16>
      %c0_19 = arith.constant 0 : index
      %c0_20 = arith.constant 0 : index
      %34 = vector.load %arg8[%c0_19, %c0_20] : memref<8x128xbf16, #tpu.memory_space<vmem>>, vector<8x128xbf16>
      tpu.vector_store %arg8[%c0_19, %c0_20], %33 {strides = array<i32>} : memref<8x128xbf16, #tpu.memory_space<vmem>>, vector<8x128xbf16>,
    } else {
    }
    %c0 = arith.constant 0 : index
    %c0_1 = arith.constant 0 : index
    %3 = vector.load %arg8[%c0, %c0_1] : memref<8x128xbf16, #tpu.memory_space<vmem>>, vector<8x128xbf16>
    %c0_2 = arith.constant 0 : index
    %c0_3 = arith.constant 0 : index
    %4 = vector.load %arg5[%c0_2, %c0_3] : memref<128x128xbf16, #tpu.memory_space<vmem>>, vector<128x128xbf16>
    %cst = arith.constant dense<0.000000e+00> : vector<8x128xf32>
    %5 = tpu.matmul %3, %4, %cst {dimension_numbers = #tpu.dot_dimension_numbers<[1], [0], [0], [1], [0, 0, 1, 1], [], []>} : vector<8x128xbf16>, vector<128x128xbf16>, vector<8x128xf32> -> vector<8x128xf32>
    %c0_4 = arith.constant 0 : index
    %c0_5 = arith.constant 0 : index
    %6 = vector.load %arg6[%c0_4, %c0_5] : memref<1x128xf32, #tpu.memory_space<vmem>>, vector<1x128xf32>
    %7 = vector.broadcast %6 : vector<1x128xf32> to vector<8x128xf32>
    %8 = arith.addf %5, %7 : vector<8x128xf32>
    %c0_6 = arith.constant 0 : index
    %c0_7 = arith.constant 0 : index
    %9 = vector.load %arg7[%c0_6, %c0_7] : memref<8x128xf32, #tpu.memory_space<vmem>>, vector<8x128xf32>
    tpu.vector_store %arg7[%c0_6, %c0_7], %8 {strides = array<i32>} : memref<8x128xf32, #tpu.memory_space<vmem>>, vector<8x128xf32>,
    return
  }
  func.func @transform_0(%arg0: i32, %arg1: i32) -> (i32, i32) {
    %c0_i32 = arith.constant 0 : i32
    %c0_i32_0 = arith.constant 0 : i32
    return %arg0, %c0_i32 : i32, i32
  }
  func.func @transform_1(%arg0: i32, %arg1: i32) -> (i32, i32) {
    %c0_i32 = arith.constant 0 : i32
    %c0_i32_0 = arith.constant 0 : i32
    %c0_i32_1 = arith.constant 0 : i32
    return %c0_i32, %c0_i32_0 : i32, i32
  }
  func.func @transform_2(%arg0: i32, %arg1: i32) -> (i32, i32) {
    %c0_i32 = arith.constant 0 : i32
    %c0_i32_0 = arith.constant 0 : i32
    %c0_i32_1 = arith.constant 0 : i32
    return %c0_i32, %c0_i32_0 : i32, i32
  }
  func.func @transform_3(%arg0: i32, %arg1: i32) -> (i32, i32) {
    %c0_i32 = arith.constant 0 : i32
    %c0_i32_0 = arith.constant 0 : i32
    return %c0_i32, %arg1 : i32, i32
  }
  func.func @transform_4(%arg0: i32, %arg1: i32) -> (i32, i32) {
    %c0_i32 = arith.constant 0 : i32
    %c0_i32_0 = arith.constant 0 : i32
    return %c0_i32, %arg1 : i32, i32
  }
  func.func @transform_5(%arg0: i32, %arg1: i32) -> (i32, i32) {
    %c0_i32 = arith.constant 0 : i32
    return %arg0, %arg1 : i32, i32
  }
}

</mosaic_0001>

<bundles_post_ra>
// kernel: tpu_custom_call.1
= control target key start
LH: loop header
LB: loop body
LE: loop exit
PB: predicated region body
PF: predicated region fallthrough
CT: control target
= control target key end

     0   :  { %s1069_s0 = inlined_call_operand.hbm [shape: f32[16,128], index: 0, kind: input, shape index: {}]   ;;  %s1070_s1 = inlined_call_operand.vmem [shape: f32[1,128], index: 1, kind: input, shape index: {}]   ;;  %s1071_s2 = inlined_call_operand.vmem [shape: f32[1,128], index: 2, kind: input, shape index: {}]   ;;  %s1072_s3 = inlined_call_operand.hbm [shape: bf16[128,128], index: 3, kind: input, shape index: {}]   ;;  %s1073_s4 = inlined_call_operand.vmem [shape: f32[1,128], index: 4, kind: input, shape index: {}]   ;;  %s1074_s5 = inlined_call_operand.hbm [shape: f32[16,128], index: 5, kind: output, shape index: {}]  }
   0x1   :  { %1077 = sst [smem:[#allocation13_spill]] %s1072_s3 }
   0x2   :  { %10 = vsyncpa [#allocation4], 0 }
   0x3   :  { %12 = vsyncpa [#allocation4 + $0x1], 0 }
   0x4   :  { %13 = vsyncpa [#allocation7], 0 }
   0x5   :  { %14 = vsyncpa [#allocation5], 0 }
   0x6   :  { %16 = vsyncpa [#allocation5 + $0x1], 0  ;;  %s877_s18 = smov 0   ;;  %s879_s19 = smov 0  }
   0x7   :  { %s881_s20 = smov 0   ;;  %s883_s21 = smov 0  }
   0x8   :  { %s885_s22 = smov 0   ;;  %s887_s23 = smov 0  }
   0x9 LB: > { %s557_s24 = sadd.s32 4294967295, %s838_s23   ;;  %s558_s25 = sadd.s32 4294967294, %s838_s23   ;;  %s838_s23 = sphi %s887_s23, %s22_s23   ;;  %s834_s22 = sphi %s885_s22, %s1097_s22   ;;  %s830_s21 = sphi %s883_s21, %s1096_s21   ;;  %s826_s20 = sphi %s881_s20, %s1095_s20   ;;  %s822_s19 = sphi %s879_s19, %s1094_s19   ;;  %s818_s18 = sphi %s877_s18, %s1093_s18  }
   0xa   : > { %p54_p0 = scmp.ne.s32.totalorder %s822_s19, %s818_s18  ;;  %p911_p1 = scmp.eq.s32.totalorder %s557_s24, 0 }
   0xb   : > { %p915_p2 = scmp.eq.s32.totalorder %s557_s24, 1  ;;  %p180_p3 = scmp.eq.s32.totalorder %s558_s25, 1 }
   0xc   : > { %p921_p4 = por %p911_p1, %p54_p0  ;;  %p559_p5 = scmp.ge.s32.totalorder %s838_s23, 1 }
   0xd   : > { %p926_p6 = por %p180_p3, %p54_p0  ;;  %p187_p7 = scmp.lt.s32.totalorder %s838_s23, 3 }
   0xe   : > { %s1080_s28 = scalar_select %p921_p4, 1, 0 }
   0xf   : > { %s1081_s29 = scalar_select %p926_p6, 1, 0 }
  0x10   : > { %p931_p8 = pnand %p559_p5, %p187_p7  ;;  %s840_s6 = smov [#allocation6]  }
  0x11   : > { %s207_s7 = sshll.u32 %s840_s6, 4  ;;  %s34_s9 = sadd.s32 1, %s834_s22  ;;  %s208_s7 = int_to_ptr.vmem [resolvable:$true] %s207_s7 }
  0x12   : > { %p621_p9 = pneg %p931_p8  ;;  %s711_s10 = scalar_lea.vmem %s208_s7, 1024 }
  0x13   : > { %p712_p13 = scmp.ne.s32.totalorder %s208_s7, %s711_s10  ;;  %p719_p5 = scmp.lt.s32.totalorder %s208_s7, %s208_s7 }
  0x14   : > { %p940_p11 = pnand %p621_p9, %p911_p1  ;;  %p720_p7 = scmp.lt.s32.totalorder %s711_s10, %s711_s10 }
  0x16   : > { %p702_p12 = pneg %p940_p11  ;;  %p721_p6 = por %p720_p7, %p719_p5 }
  0x18   : > { %p714_p0 = pnand %p712_p13, %p702_p12 }
  0x1a   : > { %p715_p3 = pneg %p714_p0 }
  0x1c   : > { %p722_p4 = pnand %p721_p6, %p715_p3 }
  0x1e   : > { %725 = shalt.err (!%p722_p4)
}
  0x1f   : > { %s841_s11 = smov 64   ;;  %s842_s12 = smov 4  }
  0x20   : > { %s1084_s3 = sld [smem:[#allocation13_spill]]  ;;  %p36_p6 = scmp.ge.s32.totalorder %s34_s9, 2 }
  0x21   : > { %s41_s15 = sadd.s32 1, %s826_s20  ;;  %p48_p4 = scmp.ne.s32.totalorder %s826_s20, %s822_s19 }
  0x22   : > { %p49_p9 = scmp.eq.s32.totalorder %s838_s23, 0  ;;  %s1099_s9 = smov (%p36_p6, %s34_s9), 0 }
  0x23   : > { %1085 = sst [smem:[#allocation12_spill]] %s1099_s9  ;;  %p964_p13 = por %p915_p2, %p48_p4 }
  0x24   : > { %p958_p12 = por %p49_p9, %p48_p4  ;;  %s38_s24 = ssub.s32 %s834_s22, %s1099_s9 }
  0x25   : > { %p634_p0 = scmp.lt.s32.totalorder %s838_s23, 2  ;;  %s227_s25 = sand.u32 1, %s826_s20  }
  0x26   : > { %624 = dma.hbm_to_vmem [thread:$0]  (!%p940_p11), %s1084_s3, 1024, %s208_s7, [#allocation7], %s841_s11, %s841_s11, %s842_s12  }
  0x27   : > { %p39_p11 = scmp.eq.s32.totalorder %s38_s24, 0  ;;  %s563_s6 = sshll.u32 %s227_s25, 3 }
  0x28   : > { %s564_s8 = sshll.u32 %s834_s22, 7  ;;  %s231_s13 = scalar_lea.vmem [#allocation3], %s563_s6 }
  0x29   : > { %s973_s7 = scalar_select %p39_p11, %s826_s20, %s41_s15  }
  0x2a   : > { %s236_s12 = scalar_lea.hbm %s1069_s0, %s564_s8  ;;  %s238_s14 = sshll.u32 %s231_s13, 4  ;;  %s239_s14 = int_to_ptr.vmem [resolvable:$true] %s238_s14 }
  0x2b   : > { %p981_p2 = pnand %p634_p0, %p958_p12  ;;  %s228_s3 = scalar_lea.sflag [#allocation4], %s227_s25 }
  0x2c   : > { %s739_s24 = scalar_lea.vmem %s239_s14, 128  ;;  %s843_s15 = smov [#allocation3]  }
  0x2d   : > { %p728_p3 = pneg %p981_p2  ;;  %p740_p5 = scmp.ne.s32.totalorder %s239_s14, %s739_s24 }
  0x2e   : > { %s744_s9 = sshll.u32 %s843_s15, 4  ;;  %s745_s9 = int_to_ptr.vmem [resolvable:$false] %s744_s9 }
  0x2f   : > { %p742_p7 = pnand %p740_p5, %p728_p3  ;;  %s746_s8 = scalar_lea.vmem %s745_s9, 256 }
  0x30   : > { %p747_p4 = scmp.lt.s32.totalorder %s239_s14, %s745_s9  ;;  %p748_p9 = scmp.lt.s32.totalorder %s746_s8, %s739_s24 }
  0x31   : > { %p743_p6 = pneg %p742_p7 }
  0x32   : > { %p749_p11 = por %p748_p9, %p747_p4 }
  0x34   : > { %p750_p10 = pnand %p749_p11, %p743_p6 }
  0x36   : > { %753 = shalt.err (!%p750_p10)
}
  0x37   : > { %628 = dma.hbm_to_vmem [thread:$0]  (!%p981_p2), %s236_s12, 128, %s239_s14, %s228_s3  }
  0x38   : > { %247 = sbr.rel (%p931_p8) target bundleno = 590 (0x24e), region = 40  ;;  %s992_s16 = sand.u32 (!%p931_p8), 1, %s822_s19  }
  0x39   : > { %s566_s25 = sshll.u32 (!%p931_p8), %s992_s16, 3  ;;  %s250_s6 = scalar_lea.sflag (!%p931_p8), [#allocation4], %s992_s16 }
  0x3a   : > { %s253_s9 = scalar_lea.vmem (!%p931_p8), [#allocation3], %s566_s25  ;;  %p1089_p12 = scmp.ne.s32.totalorder (!%p931_p8), %s1080_s28, 0 }
  0x3d   : > { %805 = dma.done.wait (%p1089_p12), %s250_s6, 128  }
  0x3e   : > { %807 = vsyncadd (%p1089_p12), %s250_s6, 4294967168 }
  0x3f   : > { %809 = dma.done.wait (%p911_p1), [#allocation7], 1024  }
  0x40   : > { %811 = vsyncadd (%p911_p1), [#allocation7], 4294966272  ;;  %v295_v0 = vld [vmem:[%s253_s9] sm:$0xff]  ;;  %v844_v6 = vmov 0.0   ;;  %v692_v8 = vld [vmem:[#allocation6 + $0x28] sm:$0xff]   ;;  %vm845_vm0 = vmmov 0  }
  0x41   : > { %296 = vadd.xlane.f32.xlu0 %v295_v0  ;;  %v690_v5 = vld [vmem:[#allocation6 + $0x38] sm:$0xff]   ;;  %593 = vmatprep.subr.bf16.mxu0 %v844_v6  ;;  %v691_v7 = vld [vmem:[#allocation6 + $0x30] sm:$0xff]   ;;  %v693_v9 = vld [vmem:[#allocation6 + $0x20] sm:$0xff]   ;;  %s581_s12 = sshll.u32 %s830_s21, 7  ;;  %s286_s13 = scalar_lea.vmem [#allocation8], %s566_s25 }
  0x42   : > { %594 = vmatpush3.bf16.msra.mxu0 %v690_v5  ;;  %v694_v10 = vld [vmem:[#allocation6 + $0x18] sm:$0xff]   ;;  %v695_v11 = vld [vmem:[#allocation6 + $0x10] sm:$0xff]   ;;  %v696_v12 = vld [vmem:[#allocation6 + $0x8] sm:$0xff]   ;;  %609 = vmatprep.mubr.msk.bf16.mxu0 %vm845_vm0, %v844_v6  ;;  %s454_s14 = sshll.u32 %s286_s13, 4  ;;  %s1021_s15 = scalar_lea.hbm %s1074_s5, %s581_s12  ;;  %s1023_s14 = int_to_ptr.vmem [resolvable:$true] %s454_s14 }
  0x43   : > { %595 = vmatprep.subr.bf16.mxu0 %v844_v6  ;;  %v697_v13 = vld [vmem:[#allocation6] sm:$0xff]   ;;  %v569_v18 = vld [vmem:[%s1070_s1] ss:$0 sm:$0xff]  ;;  %s440_s8 = scalar_lea.sflag [#allocation5], %s992_s16  ;;  %s754_s21 = scalar_lea.vmem %s1023_s14, 128 }
  0x44   : > { %v570_v20 = vld [vmem:[%s1071_s2] ss:$0 sm:$0xff]  ;;  %p755_p1 = scmp.ne.s32.totalorder %s1023_s14, %s754_s21  ;;  %s846_s25 = smov [#allocation8]  }
  0x45   : > { %v571_v25 = vld [vmem:[%s1073_s4] ss:$0 sm:$0xff]  ;;  %s758_s6 = sshll.u32 %s846_s25, 4  ;;  %s759_s6 = int_to_ptr.vmem [resolvable:$false] %s758_s6 }
  0x46   : > { %596 = vmatpush3.bf16.msra.mxu0 %v691_v7  ;;  %p756_p8 = pnand %p755_p1, %p964_p13  ;;  %s760_s9 = scalar_lea.vmem %s759_s6, 256 }
  0x47   : > { %597 = vmatprep.subr.bf16.mxu0 %v844_v6  ;;  %p761_p0 = scmp.lt.s32.totalorder %s1023_s14, %s759_s6  ;;  %p762_p2 = scmp.lt.s32.totalorder %s760_s9, %s754_s21 }
  0x48   : > { %p757_p10 = pneg %p756_p8 }
  0x49   : > { %p763_p3 = por %p762_p2, %p761_p0 }
  0x4a   : > { %598 = vmatpush3.bf16.msra.mxu0 %v692_v8 }
  0x4b   : > { %599 = vmatprep.subr.bf16.mxu0 %v844_v6  ;;  %p764_p5 = pnand %p763_p3, %p757_p10 }
  0x4e   : > { %600 = vmatpush3.bf16.msra.mxu0 %v693_v9 }
  0x4f   : > { %601 = vmatprep.subr.bf16.mxu0 %v844_v6 }
  0x52   : > { %602 = vmatpush3.bf16.msra.mxu0 %v694_v10 }
  0x53   : > { %603 = vmatprep.subr.bf16.mxu0 %v844_v6 }
  0x56   : > { %604 = vmatpush3.bf16.msra.mxu0 %v695_v11 }
  0x57   : > { %605 = vmatprep.subr.bf16.mxu0 %v844_v6 }
  0x5a   : > { %606 = vmatpush3.bf16.msra.mxu0 %v696_v12 }
  0x5b   : > { %607 = vmatprep.subr.bf16.mxu0 %v844_v6 }
  0x5e   : > { %608 = vmatpush3.bf16.msra.mxu0 %v697_v13 }
  0xca   : > { %v297_v1 = vpop.xlane.xlu0 %296 }
  0xcb   : > { %v299_v2 = vmul.f32 0.0078125, %v297_v1 }
  0xcd   : > { %v300_v3 = vsub.f32 %v295_v0, %v299_v2 }
  0xcf   : > { %v301_v4 = vmul.f32 %v300_v3, %v300_v3 }
  0xd1   : > { %302 = vadd.xlane.f32.xlu0 %v301_v4 }
 0x15a   : > { %v303_v14 = vpop.xlane.xlu0 %302 }
 0x15b   : > { %v304_v15 = vmul.f32 0.0078125, %v303_v14 }
 0x15d   : > { %v305_v16 = vadd.f32 1e-05, %v304_v15 }
 0x15f   : > { %698 = vrsqrt.f32 %v305_v16 }
 0x16c   : > { %v699_v17 = vpop.eup %698 }
 0x16d   : > { %v307_v19 = vmul.f32 %v699_v17, %v300_v3 }
 0x16f   : > { %v315_v21 = vmul.f32 %v569_v18, %v307_v19 }
 0x171   : > { %v323_v22 = vadd.f32 %v570_v20, %v315_v21 }
 0x173   : > { %v324_v23 = vpack.c.bf16 %v323_v22, %v323_v22 }
 0x175   : > { %325 = vst [vmem:[#allocation2] sm:$0xf] %v324_v23 }
 0x17c   : > { %v326_v24 = vld [vmem:[#allocation2] sm:$0xf] }
 0x17d   : > { %610 = vmatmul.mubr.bf16.vlgmr.msra.gmra.mxu0 %v326_v24 }
 0x23d   : > { %v432_v26 = vpop.f32.mrf.mxu0 }
 0x23e   : > { %v433_v27 = vadd.f32 %v571_v25, %v432_v26 }
 0x23f   : > { %v611_v28 = vpop.f32.mrf.mxu0 }
 0x240   : > { %438 = vst [vmem:[%s286_s13] sm:$0xff] %v433_v27 }
 0x241   : > { %v435_v29 = vpop.f32.mrf.mxu0 }
 0x242   : > { %767 = shalt.err (!%p764_p5)
}
 0x243   : > { %s768_s3 = scalar_lea.hbm %s1021_s15, 128  ;;  %s772_s28 = scalar_lea.hbm %s1074_s5, 256 }
 0x244   : > { %p769_p7 = scmp.ne.s32.totalorder %s1021_s15, %s768_s3  ;;  %p773_p9 = scmp.lt.s32.totalorder %s1021_s15, %s1074_s5 }
 0x245   : > { %p774_p11 = scmp.lt.s32.totalorder %s772_s28, %s768_s3 }
 0x246   : > { %p770_p6 = pnand %p769_p7, %p964_p13 }
 0x247   : > { %p775_p12 = por %p774_p11, %p773_p9 }
 0x248   : > { %p771_p4 = pneg %p770_p6 }
 0x24a   : > { %p776_p1 = pnand %p775_p12, %p771_p4 }
 0x24c   : > { %779 = shalt.err (!%p776_p1)
}
 0x24d   : > { %619 = dma.vmem_to_hbm [thread:$0]  (%p964_p13), %s1023_s14, 128, %s1021_s15, %s440_s8   ;;  %v612_v30 = vpop.f32.mrf.mxu0 }
 0x24e PF: > { %s466_s11 = sand.u32 1, %s818_s18   ;;  %p1090_p8 = scmp.ne.s32.totalorder %s1081_s29, 0 }
 0x24f   : > { %p1091_p10 = scmp.ge.s32.totalorder %s838_s23, 2  ;;  %s467_s12 = scalar_lea.sflag [#allocation5], %s466_s11 }
 0x251   : > { %p630_p0 = pnand %p1091_p10, %p1090_p8 }
 0x253   : > { %p631_p2 = pneg %p630_p0 }
 0x255   : > { %813 = dma.done.wait (%p631_p2), %s467_s12, 128  }
 0x256   : > { %815 = vsyncadd (%p631_p2), %s467_s12, 4294967168  ;;  %s22_s23 = sadd.s32 1, %s838_s23   ;;  %s1092_s17 = sld [smem:[#allocation12_spill]] }
 0x257   : > { %p19_p3 = scmp.ge.s32.totalorder %s22_s23, 4   ;;  %s1093_s18 = smov %s822_s19 }
 0x258   : > { %s1094_s19 = smov %s826_s20  ;;  %s1095_s20 = smov %s973_s7 }
 0x259   : > { %s1096_s21 = smov %s834_s22  ;;  %21 = sbr.rel (!%p19_p3) target bundleno = 9 (0x9), region = 97 }
 0x25c   : > { %s1097_s22 = smov %s1092_s17 }
 0x25e   :  { %472 = vsyncpa [#allocation4], 1 }
 0x25f   :  { %474 = vsyncpa [#allocation4 + $0x1], 1 }
 0x260   :  { %475 = vsyncpa [#allocation7], 1 }
 0x261   :  { %476 = vsyncpa [#allocation5], 1 }
 0x262   :  { %478 = vsyncpa [#allocation5 + $0x1], 1 }

</bundles_post_ra>
